<compile_context>
chip_gen: v6e
topology: v6e:2x2x1
jax: 0.10.0
libtpu: 0.0.40
codegen_flags: <defaults>
</compile_context>

<pallas_src>
import functools

import jax
import jax.numpy as jnp
from jax.experimental import pallas as pl
from jax.experimental.pallas import tpu as pltpu

_INV_SQRT2 = 0.7071067811865476
_MIB = 1024 * 1024


def _gelu_exact(x):
    # PyTorch F.gelu default (approximate='none'): 0.5 * x * (1 + erf(x / sqrt(2)))
    return 0.5 * x * (1.0 + jax.lax.erf(x * _INV_SQRT2))


def _stats_scale_out(x, w, s, st, gamma_row, beta_lanes, t):
    """Per-row DishTS stats + normalized output for one (tb, T*N) block (all f32)."""
    # phil[b, n] = gelu( sum_t x[b, t, n] * w_l[t, n] )  -- skinny MXU matmul
    phil = _gelu_exact(jnp.dot(x, w, preferred_element_type=jnp.float32))      # (tb, N)
    phil_b = jnp.dot(phil, st, preferred_element_type=jnp.float32)             # (tb, L) broadcast
    diff = x - phil_b
    # xil[b, n] = sum_t (x - phil)^2 / (T - 1)   (numerically safe diff form)
    xil = jnp.dot(diff * diff, s, preferred_element_type=jnp.float32) / jnp.float32(t - 1)
    scale = gamma_row * jax.lax.rsqrt(xil + 1e-8)                              # (tb, N)
    scale_b = jnp.dot(scale, st, preferred_element_type=jnp.float32)           # (tb, L)
    out = diff * scale_b + beta_lanes
    return phil, scale, out


def _dish_fwd_kernel(x_ref, w_ref, s_ref, st_ref, gamma_ref, beta_l_ref,
                     out_ref, *, t):
    x = x_ref[...].astype(jnp.float32)
    _, _, out = _stats_scale_out(x, w_ref[...], s_ref[...], st_ref[...],
                                 gamma_ref[...], beta_l_ref[...], t)
    out_ref[...] = out.astype(out_ref.dtype)


def _dish_fwd_dec_kernel(x_ref, dec_ref, w_ref, s_ref, st_ref, std_ref,
                         gamma_ref, beta_l_ref, beta_ld_ref,
                         out_ref, dec_out_ref, *, t):
    x = x_ref[...].astype(jnp.float32)
    phil, scale, out = _stats_scale_out(x, w_ref[...], s_ref[...], st_ref[...],
                                        gamma_ref[...], beta_l_ref[...], t)
    out_ref[...] = out.astype(out_ref.dtype)
    # dec_inp normalized with the SAME per-(b, n) stats, fused in-register.
    dec = dec_ref[...].astype(jnp.float32)
    phil_bd = jnp.dot(phil, std_ref[...], preferred_element_type=jnp.float32)
    scale_bd = jnp.dot(scale, std_ref[...], preferred_element_type=jnp.float32)
    dec_out_ref[...] = ((dec - phil_bd) * scale_bd + beta_ld_ref[...]).astype(dec_out_ref.dtype)


def _vmem_budgets():
    """(vmem_capacity, per-step working-set budget, vmem_limit_bytes) for this chip."""
    cap = 64 * _MIB                                  # conservative default (v7x per-TC VMEM)
    try:
        cap = int(getattr(pltpu.get_tpu_info(), "vmem_capacity_bytes", cap))
    except Exception:
        pass
    work_budget = min(cap * 3 // 8, 40 * _MIB)       # ~24 MiB on v7x, 40 MiB on v5e/v6e
    vmem_limit = min(cap * 3 // 4, work_budget + 24 * _MIB)   # ~48 MiB v7x, 64 MiB v5e/v6e
    return cap, work_budget, vmem_limit


def _pick_batch_tile(b, per_row_bytes, budget_bytes):
    """Largest batch tile (multiple of 8 dividing b, or b itself) fitting the VMEM budget."""
    if b <= 8:
        return b
    max_rows = max(8, budget_bytes // max(per_row_bytes, 1))
    cands = [d for d in range(8, b + 1, 8) if b % d == 0]
    if not cands:
        # b > 8 but not a multiple of 8: only a full-batch block satisfies the
        # "(8,128)-divisible or full-dim" sublane constraint.
        return b
    fitting = [c for c in cands if c <= max_rows]
    tb = max(fitting) if fitting else min(cands)
    # Prefer >= 2 grid steps so ("parallel",) can shard batch blocks across
    # v7x's 2 TensorCores (one extra ~0.35us step elsewhere -- negligible).
    if tb == b and (b // 2) in cands and (b // 2) <= max_rows:
        tb = b // 2
    return tb


def dish_ts_forward(batch_x, reduce_mlayer, gamma, beta, dec_inp=None):
    """DishTS.forward(mode='forward'). Returns (normalized batch_x, normalized dec_inp or None)."""
    B, T, N = batch_x.shape
    L = T * N
    f32 = jnp.float32

    # FREE relayout: (B, T, N) -> (B, T*N) merges contiguous trailing dims.
    x2d = batch_x.reshape(B, L)

    # Parameters stay f32 (PyTorch fp32 parameter math).  Only the k=0 (phil)
    # branch of reduce_mlayer is live in forward mode.
    eye = jnp.eye(N, dtype=f32)
    w_l = reduce_mlayer[:, :, 0].astype(f32)                                  # (N, T)
    w_mat = (jnp.transpose(w_l)[:, :, None] * eye[None]).reshape(L, N)        # (L, N)
    s_mat = jnp.tile(eye, (T, 1))                                             # (L, N)
    st_mat = jnp.transpose(s_mat)                                             # (N, L)
    gamma_row = gamma.reshape(1, N).astype(f32)                               # (1, N)
    beta_lanes = jnp.tile(beta.astype(f32), T).reshape(1, L)                  # (1, L)

    has_dec = dec_inp is not None
    itemsize = jnp.dtype(batch_x.dtype).itemsize
    # Per batch-row, per grid step: double-buffered x/out DMA blocks + f32 temporaries.
    per_row = 4 * L * itemsize + 4 * L * 4
    if has_dec:
        Bd, Td, Nd = dec_inp.shape
        assert Bd == B and Nd == N, "dec_inp must share batch/series dims with batch_x"
        Ld = Td * N
        dec2d = dec_inp.reshape(B, Ld)                                        # free relayout
        std_mat = jnp.transpose(jnp.tile(eye, (Td, 1)))                       # (N, Ld)
        beta_lanes_d = jnp.tile(beta.astype(f32), Td).reshape(1, Ld)          # (1, Ld)
        per_row += 4 * Ld * jnp.dtype(dec_inp.dtype).itemsize + 2 * Ld * 4

    cap, budget, vmem_limit = _vmem_budgets()
    tb = _pick_batch_tile(B, per_row, budget)
    grid = (B // tb,)
    # Graceful headroom if the smallest legal tile still exceeds the default budget.
    est_ws = tb * per_row + 2 * _MIB
    if est_ws > vmem_limit:
        vmem_limit = min(int(cap * 0.9), est_ws + 4 * _MIB)

    x_spec = pl.BlockSpec((tb, L), lambda i: (i, 0))
    const2 = lambda shape: pl.BlockSpec(shape, lambda i: (0, 0))   # grid-invariant, VMEM-resident

    if has_dec:
        kernel = functools.partial(_dish_fwd_dec_kernel, t=T)
        inputs = (x2d, dec2d, w_mat, s_mat, st_mat, std_mat,
                  gamma_row, beta_lanes, beta_lanes_d)
        in_specs = [x_spec,
                    pl.BlockSpec((tb, Ld), lambda i: (i, 0)),
                    const2((L, N)), const2((L, N)), const2((N, L)), const2((N, Ld)),
                    const2((1, N)), const2((1, L)), const2((1, Ld))]
        out_shape = (jax.ShapeDtypeStruct((B, L), batch_x.dtype),
                     jax.ShapeDtypeStruct((B, Ld), dec_inp.dtype))
        out_specs = [x_spec, pl.BlockSpec((tb, Ld), lambda i: (i, 0))]
    else:
        kernel = functools.partial(_dish_fwd_kernel, t=T)
        inputs = (x2d, w_mat, s_mat, st_mat, gamma_row, beta_lanes)
        in_specs = [x_spec, const2((L, N)), const2((L, N)), const2((N, L)),
                    const2((1, N)), const2((1, L))]
        out_shape = jax.ShapeDtypeStruct((B, L), batch_x.dtype)
        out_specs = x_spec

    mm_flops = 8 * B * L * N + (4 * B * Ld * N if has_dec else 0)
    ew_flops = 8 * B * L + (4 * B * Ld if has_dec else 0)
    bytes_accessed = (2 * B * L * itemsize
                      + (2 * B * Ld * jnp.dtype(dec_inp.dtype).itemsize if has_dec else 0)
                      + 3 * L * N * 4 + 2 * L * 4)
    cost = pl.CostEstimate(flops=mm_flops + ew_flops,
                           transcendentals=2 * B * N,
                           bytes_accessed=bytes_accessed)

    result = pl.pallas_call(
        kernel,
        out_shape=out_shape,
        grid_spec=pltpu.PrefetchScalarGridSpec(
            num_scalar_prefetch=0,
            grid=grid,
            in_specs=in_specs,
            out_specs=out_specs,
        ),
        compiler_params=pltpu.CompilerParams(
            dimension_semantics=("parallel",),
            vmem_limit_bytes=vmem_limit,
        ),
        cost_estimate=cost,
    )(*inputs)

    if has_dec:
        out2d, dec_out2d = result
        return out2d.reshape(B, T, N), dec_out2d.reshape(B, Td, N)   # free un-merge
    return result.reshape(B, T, N), None


# ----------------------------- pure-JAX reference -----------------------------

def _reference_forward(batch_x, reduce_mlayer, gamma, beta, dec_inp=None):
    w_l = reduce_mlayer[:, :, 0]                                   # (N, T)
    phil = _gelu_exact(jnp.sum(batch_x * jnp.transpose(w_l)[None], axis=1, keepdims=True))
    T = batch_x.shape[1]
    xil = jnp.sum((batch_x - phil) ** 2, axis=1, keepdims=True) / (T - 1)

    def fproc(v):
        return (v - phil) / jnp.sqrt(xil + 1e-8) * gamma + beta

    return fproc(batch_x), (None if dec_inp is None else fproc(dec_inp))


if __name__ == "__main__":
    key = jax.random.PRNGKey(0)
    k1, k2, k3, k4, k5, k6 = jax.random.split(key, 6)

    fwd = jax.jit(dish_ts_forward)

    # --- case 1: batch=2, lookback=16, n_series=4; with and without dec_inp ---
    B, T, N, Td = 2, 16, 4, 8
    batch_x = jax.random.normal(k1, (B, T, N), dtype=jnp.float32)
    reduce_mlayer = jax.random.uniform(k2, (N, T, 2), dtype=jnp.float32) / T   # dish_init='standard'
    gamma = jnp.ones((N,), dtype=jnp.float32)
    beta = jnp.zeros((N,), dtype=jnp.float32)
    dec_inp = jax.random.normal(k3, (B, Td, N), dtype=jnp.float32)

    out, dec_none = fwd(batch_x, reduce_mlayer, gamma, beta)
    out = jax.block_until_ready(out)
    assert out.shape == (B, T, N) and dec_none is None
    ref_out, _ = _reference_forward(batch_x, reduce_mlayer, gamma, beta)
    assert jnp.allclose(out, ref_out, atol=1e-4, rtol=1e-4), "batch_x mismatch vs reference"

    out2, dec_out2 = fwd(batch_x, reduce_mlayer, gamma, beta, dec_inp)
    dec_out2 = jax.block_until_ready(dec_out2)
    ref_out2, ref_dec2 = _reference_forward(batch_x, reduce_mlayer, gamma, beta, dec_inp)
    assert jnp.allclose(out2, ref_out2, atol=1e-4, rtol=1e-4), "batch_x mismatch (dec path)"
    assert jnp.allclose(dec_out2, ref_dec2, atol=1e-4, rtol=1e-4), "dec_inp mismatch vs reference"

    # --- case 2: the module's default args (n_series=1, seq_len=61), batch=16
    #     exercises a multi-step grid (tb=8, grid=(2,)) and the fused dec path ---
    B2, T2, N2, Td2 = 16, 61, 1, 12
    bx2 = jax.random.normal(k4, (B2, T2, N2), dtype=jnp.float32)
    rm2 = jax.random.uniform(k5, (N2, T2, 2), dtype=jnp.float32) / T2
    g2 = jnp.ones((N2,), dtype=jnp.float32) * 1.5
    b2 = jnp.ones((N2,), dtype=jnp.float32) * 0.25
    dec2 = jax.random.normal(k6, (B2, Td2, N2), dtype=jnp.float32)

    o3, d3 = fwd(bx2, rm2, g2, b2, dec2)
    d3 = jax.block_until_ready(d3)
    r3, rd3 = _reference_forward(bx2, rm2, g2, b2, dec2)
    assert jnp.allclose(o3, r3, atol=1e-4, rtol=1e-4), "case-2 batch_x mismatch"
    assert jnp.allclose(d3, rd3, atol=1e-4, rtol=1e-4), "case-2 dec_inp mismatch"

    print("KERNEL_OK")
</pallas_src>

<mosaic_0001>
module attributes {stable_mosaic.version = 11 : i64} {
  func.func @_dish_fwd_kernel(%arg0: i32, %arg1: memref<2x64xf32, #tpu.memory_space<vmem>>, %arg2: memref<64x4xf32, #tpu.memory_space<vmem>>, %arg3: memref<64x4xf32, #tpu.memory_space<vmem>>, %arg4: memref<4x64xf32, #tpu.memory_space<vmem>>, %arg5: memref<1x4xf32, #tpu.memory_space<vmem>>, %arg6: memref<1x64xf32, #tpu.memory_space<vmem>>, %arg7: memref<2x64xf32, #tpu.memory_space<vmem>>) attributes {dimension_semantics = [#tpu.dimension_semantics<parallel>], iteration_bounds = array<i64: 1>, scalar_prefetch = 0 : i64, scratch_operands = 0 : i64, tpu.core_type = #tpu.core_type<tc>, window_params = [{transform_indices = @transform_0, window_bounds = array<i64: 2, 64>}, {pipeline_mode = #tpu.pipeline_mode<synchronous>, transform_indices = @transform_1, window_bounds = array<i64: 64, 4>}, {pipeline_mode = #tpu.pipeline_mode<synchronous>, transform_indices = @transform_2, window_bounds = array<i64: 64, 4>}, {pipeline_mode = #tpu.pipeline_mode<synchronous>, transform_indices = @transform_3, window_bounds = array<i64: 4, 64>}, {pipeline_mode = #tpu.pipeline_mode<synchronous>, transform_indices = @transform_4, window_bounds = array<i64: 1, 4>}, {pipeline_mode = #tpu.pipeline_mode<synchronous>, transform_indices = @transform_5, window_bounds = array<i64: 1, 64>}, {transform_indices = @transform_6, window_bounds = array<i64: 2, 64>}]} {
    %c0 = arith.constant 0 : index
    %c0_0 = arith.constant 0 : index
    %0 = vector.load %arg1[%c0, %c0_0] : memref<2x64xf32, #tpu.memory_space<vmem>>, vector<2x64xf32>
    %c0_1 = arith.constant 0 : index
    %c0_2 = arith.constant 0 : index
    %1 = vector.load %arg2[%c0_1, %c0_2] : memref<64x4xf32, #tpu.memory_space<vmem>>, vector<64x4xf32>
    %c0_3 = arith.constant 0 : index
    %c0_4 = arith.constant 0 : index
    %2 = vector.load %arg3[%c0_3, %c0_4] : memref<64x4xf32, #tpu.memory_space<vmem>>, vector<64x4xf32>
    %c0_5 = arith.constant 0 : index
    %c0_6 = arith.constant 0 : index
    %3 = vector.load %arg4[%c0_5, %c0_6] : memref<4x64xf32, #tpu.memory_space<vmem>>, vector<4x64xf32>
    %c0_7 = arith.constant 0 : index
    %c0_8 = arith.constant 0 : index
    %4 = vector.load %arg5[%c0_7, %c0_8] : memref<1x4xf32, #tpu.memory_space<vmem>>, vector<1x4xf32>
    %c0_9 = arith.constant 0 : index
    %c0_10 = arith.constant 0 : index
    %5 = vector.load %arg6[%c0_9, %c0_10] : memref<1x64xf32, #tpu.memory_space<vmem>>, vector<1x64xf32>
    %cst = arith.constant dense<0.000000e+00> : vector<2x4xf32>
    %6 = tpu.matmul %0, %1, %cst {dimension_numbers = #tpu.dot_dimension_numbers<[1], [0], [0], [1], [0, 0, 1, 1], [], []>} : vector<2x64xf32>, vector<64x4xf32>, vector<2x4xf32> -> vector<2x4xf32>
    %cst_11 = arith.constant 5.000000e-01 : f32
    %7 = vector.broadcast %cst_11 : f32 to vector<2x4xf32>
    %8 = arith.mulf %7, %6 : vector<2x4xf32>
    %cst_12 = arith.constant 0.707106769 : f32
    %9 = vector.broadcast %cst_12 : f32 to vector<2x4xf32>
    %10 = arith.mulf %6, %9 : vector<2x4xf32>
    %11 = math.erf %10 : vector<2x4xf32>
    %cst_13 = arith.constant 1.000000e+00 : f32
    %12 = vector.broadcast %cst_13 : f32 to vector<2x4xf32>
    %13 = arith.addf %12, %11 : vector<2x4xf32>
    %14 = arith.mulf %8, %13 : vector<2x4xf32>
    %cst_14 = arith.constant dense<0.000000e+00> : vector<2x64xf32>
    %15 = tpu.matmul %14, %3, %cst_14 {dimension_numbers = #tpu.dot_dimension_numbers<[1], [0], [0], [1], [0, 0, 1, 1], [], []>} : vector<2x4xf32>, vector<4x64xf32>, vector<2x64xf32> -> vector<2x64xf32>
    %16 = arith.subf %0, %15 : vector<2x64xf32>
    %17 = arith.mulf %16, %16 : vector<2x64xf32>
    %cst_15 = arith.constant dense<0.000000e+00> : vector<2x4xf32>
    %18 = tpu.matmul %17, %2, %cst_15 {dimension_numbers = #tpu.dot_dimension_numbers<[1], [0], [0], [1], [0, 0, 1, 1], [], []>} : vector<2x64xf32>, vector<64x4xf32>, vector<2x4xf32> -> vector<2x4xf32>
    %cst_16 = arith.constant 1.500000e+01 : f32
    %19 = vector.broadcast %cst_16 : f32 to vector<2x4xf32>
    %20 = arith.divf %18, %19 : vector<2x4xf32>
    %cst_17 = arith.constant 9.99999993E-9 : f32
    %21 = vector.broadcast %cst_17 : f32 to vector<2x4xf32>
    %22 = arith.addf %20, %21 : vector<2x4xf32>
    %23 = math.rsqrt %22 : vector<2x4xf32>
    %24 = vector.broadcast %4 : vector<1x4xf32> to vector<2x4xf32>
    %25 = arith.mulf %24, %23 : vector<2x4xf32>
    %cst_18 = arith.constant dense<0.000000e+00> : vector<2x64xf32>
    %26 = tpu.matmul %25, %3, %cst_18 {dimension_numbers = #tpu.dot_dimension_numbers<[1], [0], [0], [1], [0, 0, 1, 1], [], []>} : vector<2x4xf32>, vector<4x64xf32>, vector<2x64xf32> -> vector<2x64xf32>
    %27 = arith.mulf %16, %26 : vector<2x64xf32>
    %28 = vector.broadcast %5 : vector<1x64xf32> to vector<2x64xf32>
    %29 = arith.addf %27, %28 : vector<2x64xf32>
    %c0_19 = arith.constant 0 : index
    %c0_20 = arith.constant 0 : index
    %30 = vector.load %arg7[%c0_19, %c0_20] : memref<2x64xf32, #tpu.memory_space<vmem>>, vector<2x64xf32>
    tpu.vector_store %arg7[%c0_19, %c0_20], %29 {strides = array<i32>} : memref<2x64xf32, #tpu.memory_space<vmem>>, vector<2x64xf32>,
    return
  }
  func.func @transform_0(%arg0: i32) -> (i32, i32) {
    %c0_i32 = arith.constant 0 : i32
    %c0_i32_0 = arith.constant 0 : i32
    return %arg0, %c0_i32 : i32, i32
  }
  func.func @transform_1(%arg0: i32) -> (i32, i32) {
    %c0_i32 = arith.constant 0 : i32
    %c0_i32_0 = arith.constant 0 : i32
    %c0_i32_1 = arith.constant 0 : i32
    return %c0_i32, %c0_i32_0 : i32, i32
  }
  func.func @transform_2(%arg0: i32) -> (i32, i32) {
    %c0_i32 = arith.constant 0 : i32
    %c0_i32_0 = arith.constant 0 : i32
    %c0_i32_1 = arith.constant 0 : i32
    return %c0_i32, %c0_i32_0 : i32, i32
  }
  func.func @transform_3(%arg0: i32) -> (i32, i32) {
    %c0_i32 = arith.constant 0 : i32
    %c0_i32_0 = arith.constant 0 : i32
    %c0_i32_1 = arith.constant 0 : i32
    return %c0_i32, %c0_i32_0 : i32, i32
  }
  func.func @transform_4(%arg0: i32) -> (i32, i32) {
    %c0_i32 = arith.constant 0 : i32
    %c0_i32_0 = arith.constant 0 : i32
    %c0_i32_1 = arith.constant 0 : i32
    return %c0_i32, %c0_i32_0 : i32, i32
  }
  func.func @transform_5(%arg0: i32) -> (i32, i32) {
    %c0_i32 = arith.constant 0 : i32
    %c0_i32_0 = arith.constant 0 : i32
    %c0_i32_1 = arith.constant 0 : i32
    return %c0_i32, %c0_i32_0 : i32, i32
  }
  func.func @transform_6(%arg0: i32) -> (i32, i32) {
    %c0_i32 = arith.constant 0 : i32
    %c0_i32_0 = arith.constant 0 : i32
    return %arg0, %c0_i32 : i32, i32
  }
}

</mosaic_0001>

<bundles_post_ra>
// kernel: tile.18
= control target key start
LH: loop header
LB: loop body
LE: loop exit
PB: predicated region body
PF: predicated region fallthrough
CT: control target
= control target key end

     0   :  { %s28_s0 = inlined_call_operand.vmem [shape: f32[4], index: 0, kind: input, shape index: {}]   ;;  %s29_s1 = inlined_call_operand.vmem [shape: f32[16,4], index: 1, kind: output, shape index: {}]  }
   0x1   :  { %v4_v0 = vld [vmem:[%s28_s0] ss:$0 sm:$0xff] }
   0x2   :  { %5 = vst [vmem:[%s29_s1] sm:$0xff] %v4_v0  ;;  %8 = vst [vmem:[%s29_s1 + $0x8] sm:$0xff] %v4_v0 }

// kernel: tile.19
= control target key start
LH: loop header
LB: loop body
LE: loop exit
PB: predicated region body
PF: predicated region fallthrough
CT: control target
= control target key end

     0   :  { %s133_s10 = smov 60   ;;  %s134_s11 = smov 52   ;;  %vm3_vm0 = vcmask 31744   ;;  %vm9_vm1 = vcmask 523744   ;;  %vm15_vm2 = vcmask 490944   ;;  %vm21_vm3 = vcmask 458144   ;;  %s209_s0 = inlined_call_operand.vmem [shape: f32[16,4], index: 0, kind: input, shape index: {}]   ;;  %s210_s1 = inlined_call_operand.vmem [shape: f32[1,64], index: 1, kind: output, shape index: {}]  }
   0x1   :  { %v103_v0 = vld [vmem:[%s209_s0 + $0xf] sm:$0x1]   ;;  %v105_v1 = vld [vmem:[%s209_s0 + $0xd] sm:$0x1]   ;;  %v104_v2 = vld [vmem:[%s209_s0 + $0xe] sm:$0x1]  }
   0x2   :  { %7 = vrot.lane.b32.xlu0 %v103_v0, %s133_s10  ;;  %19 = vrot.lane.b32.xlu1 %v105_v1, %s134_s11  ;;  %v106_v3 = vld [vmem:[%s209_s0 + $0xc] sm:$0x1]   ;;  %s135_s16 = smov 56   ;;  %s136_s17 = smov 48   ;;  %v107_v4 = vld [vmem:[%s209_s0 + $0xb] sm:$0x1]  }
   0x3   :  { %v108_v5 = vld [vmem:[%s209_s0 + $0xa] sm:$0x1]   ;;  %v2_v6 = vld [vmem:[%s209_s0] sm:$0x1]   ;;  %s137_s24 = smov 44   ;;  %s138_s25 = smov 40  }
   0x4   :  { %4 = vst.msk [vmem:[#allocation0] sm:$0x1] %vm3_vm0, %v2_v6   ;;  %v109_v7 = vld [vmem:[%s209_s0 + $0x9] sm:$0x1]   ;;  %v110_v8 = vld [vmem:[%s209_s0 + $0x8] sm:$0x1]  }
   0x5   :  { %s139_s30 = smov 36   ;;  %s140_s2 = smov 32   ;;  %v111_v9 = vld [vmem:[%s209_s0 + $0x7] sm:$0x1]   ;;  %v112_v10 = vld [vmem:[%s209_s0 + $0x6] sm:$0x1]  }
   0x6   :  { %13 = vrot.lane.b32.xlu0 %v104_v2, %s135_s16  ;;  %25 = vrot.lane.b32.xlu1 %v106_v3, %s136_s17  ;;  %s141_s7 = smov 28   ;;  %s142_s8 = smov 24   ;;  %v113_v11 = vld [vmem:[%s209_s0 + $0x5] sm:$0x1]   ;;  %v114_v12 = vld [vmem:[%s209_s0 + $0x4] sm:$0x1]  }
   0x7   :  { %s143_s13 = smov 20   ;;  %s144_s14 = smov 16   ;;  %v115_v13 = vld [vmem:[%s209_s0 + $0x3] sm:$0x1]   ;;  %v116_v14 = vld [vmem:[%s209_s0 + $0x2] sm:$0x1]  }
   0x8   :  { %s145_s19 = smov 12   ;;  %s146_s20 = smov 8   ;;  %v117_v15 = vld [vmem:[%s209_s0 + $0x1] sm:$0x1]   ;;  %vm27_vm4 = vcmask 425344   ;;  %vm33_vm5 = vcmask 392544  }
   0x9   :  { %s147_s0 = smov 4   ;;  %vm39_vm6 = vcmask 359744   ;;  %vm45_vm7 = vcmask 326944   ;;  %vm51_vm8 = vcmask 294144   ;;  %vm57_vm9 = vcmask 261344  }
   0xa   :  { %31 = vrot.lane.b32.xlu0 %v107_v4, %s137_s24  ;;  %37 = vrot.lane.b32.xlu1 %v108_v5, %s138_s25  ;;  %vm63_vm10 = vcmask 228544   ;;  %vm69_vm11 = vcmask 195744   ;;  %vm75_vm12 = vcmask 162944   ;;  %vm81_vm13 = vcmask 130144  }
   0xb   :  { %vm87_vm14 = vcmask 97344   ;;  %vm93_vm15 = vcmask 64544  }
   0xe   :  { %43 = vrot.lane.b32.xlu0 %v109_v7, %s139_s30  ;;  %49 = vrot.lane.b32.xlu1 %v110_v8, %s140_s2 }
  0x12   :  { %55 = vrot.lane.b32.xlu0 %v111_v9, %s141_s7  ;;  %61 = vrot.lane.b32.xlu1 %v112_v10, %s142_s8 }
  0x16   :  { %67 = vrot.lane.b32.xlu0 %v113_v11, %s143_s13  ;;  %73 = vrot.lane.b32.xlu1 %v114_v12, %s144_s14 }
  0x1a   :  { %79 = vrot.lane.b32.xlu0 %v115_v13, %s145_s19  ;;  %85 = vrot.lane.b32.xlu1 %v116_v14, %s146_s20 }
  0x1e   :  { %91 = vrot.lane.b32.xlu0 %v117_v15, %s147_s0 }
  0x74   :  { %v8_v16 = vpop.permute.xlu0 %7   ;;  %v20_v17 = vpop.permute.xlu1 %19  }
  0x75   :  { %10 = vst.msk [vmem:[#allocation0] sm:$0x1] %vm9_vm1, %v8_v16  }
  0x78   :  { %v14_v18 = vpop.permute.xlu0 %13   ;;  %v26_v19 = vpop.permute.xlu1 %25  }
  0x79   :  { %16 = vst.msk [vmem:[#allocation0] sm:$0x1] %vm15_vm2, %v14_v18  }
  0x7a   :  { %22 = vst.msk [vmem:[#allocation0] sm:$0x1] %vm21_vm3, %v20_v17  }
  0x7b   :  { %28 = vst.msk [vmem:[#allocation0] sm:$0x1] %vm27_vm4, %v26_v19  }
  0x7c   :  { %v32_v20 = vpop.permute.xlu0 %31   ;;  %v38_v21 = vpop.permute.xlu1 %37  }
  0x7d   :  { %34 = vst.msk [vmem:[#allocation0] sm:$0x1] %vm33_vm5, %v32_v20  }
  0x7e   :  { %40 = vst.msk [vmem:[#allocation0] sm:$0x1] %vm39_vm6, %v38_v21  }
  0x80   :  { %v44_v22 = vpop.permute.xlu0 %43   ;;  %v50_v23 = vpop.permute.xlu1 %49  }
  0x81   :  { %46 = vst.msk [vmem:[#allocation0] sm:$0x1] %vm45_vm7, %v44_v22  }
  0x82   :  { %52 = vst.msk [vmem:[#allocation0] sm:$0x1] %vm51_vm8, %v50_v23  }
  0x84   :  { %v56_v24 = vpop.permute.xlu0 %55   ;;  %v62_v25 = vpop.permute.xlu1 %61  }
  0x85   :  { %58 = vst.msk [vmem:[#allocation0] sm:$0x1] %vm57_vm9, %v56_v24  }
  0x86   :  { %64 = vst.msk [vmem:[#allocation0] sm:$0x1] %vm63_vm10, %v62_v25  }
  0x88   :  { %v68_v26 = vpop.permute.xlu0 %67   ;;  %v74_v27 = vpop.permute.xlu1 %73  }
  0x89   :  { %70 = vst.msk [vmem:[#allocation0] sm:$0x1] %vm69_vm11, %v68_v26  }
  0x8a   :  { %76 = vst.msk [vmem:[#allocation0] sm:$0x1] %vm75_vm12, %v74_v27  }
  0x8c   :  { %v80_v28 = vpop.permute.xlu0 %79   ;;  %v86_v29 = vpop.permute.xlu1 %85  }
  0x8d   :  { %82 = vst.msk [vmem:[#allocation0] sm:$0x1] %vm81_vm13, %v80_v28  }
  0x8e   :  { %88 = vst.msk [vmem:[#allocation0] sm:$0x1] %vm87_vm14, %v86_v29  }
  0x90   :  { %v92_v30 = vpop.permute.xlu0 %91  }
  0x91   :  { %94 = vst.msk [vmem:[#allocation0] sm:$0x1] %vm93_vm15, %v92_v30  }
  0x98   :  { %v99_v31 = vld [vmem:[#allocation0] sm:$0x1] }
  0x99   :  { %102 = vst [vmem:[%s210_s1] sm:$0x1] %v99_v31 }

// kernel: dish_ts_forward.1
= control target key start
LH: loop header
LB: loop body
LE: loop exit
PB: predicated region body
PF: predicated region fallthrough
CT: control target
= control target key end

     0   :  { %v457_v0 = vmov 0.0   ;;  %vm458_vm0 = vmmov 0   ;;  %vm43_vm1 = vcmask 523264   ;;  %vm126_vm2 = vcmask 1043456   ;;  %s587_s1 = inlined_call_operand.vmem [shape: f32[64,4], index: 1, kind: input, shape index: {}]   ;;  %s588_s0 = inlined_call_operand.vmem [shape: f32[2,64], index: 0, kind: input, shape index: {}]   ;;  %s589_s3 = inlined_call_operand.vmem [shape: f32[4,64], index: 3, kind: input, shape index: {}]   ;;  %s590_s2 = inlined_call_operand.vmem [shape: f32[64,4], index: 2, kind: input, shape index: {}]   ;;  %s591_s4 = inlined_call_operand.vmem [shape: f32[1,4], index: 4, kind: input, shape index: {}]   ;;  %s592_s5 = inlined_call_operand.vmem [shape: f32[1,64], index: 5, kind: input, shape index: {}]   ;;  %s593_s6 = inlined_call_operand.vmem [shape: f32[2,64], index: 6, kind: output, shape index: {}]  }
   0x1   :  { %403 = vmatprep.subr.mxu0 %v457_v0  ;;  %v31_v1 = vld [vmem:[%s587_s1 + $0x38] sm:$0xff]  ;;  %v30_v2 = vld [vmem:[%s587_s1 + $0x30] sm:$0xff]  ;;  %419 = vmatprep.mubr.msk.f32.mxu0 %vm458_vm0, %v457_v0  ;;  %v29_v3 = vld [vmem:[%s587_s1 + $0x28] sm:$0xff]  ;;  %vm122_vm3 = vcmask 31744   ;;  %vm367_vm4 = vcmask 517120  }
   0x2   :  { %404 = vmatpush3.msra.mxu0 %v31_v1  ;;  %422 = vmatprep.subr.mxu1 %v457_v0  ;;  %v28_v4 = vld [vmem:[%s587_s1 + $0x20] sm:$0xff]  ;;  %v27_v5 = vld [vmem:[%s587_s1 + $0x18] sm:$0xff]  ;;  %v26_v6 = vld [vmem:[%s587_s1 + $0x10] sm:$0xff] }
   0x3   :  { %405 = vmatprep.subr.mxu0 %v457_v0  ;;  %424 = vmatprep.mubr.msk.f32.mxu1 %vm458_vm0, %v457_v0  ;;  %v25_v7 = vld [vmem:[%s587_s1 + $0x8] sm:$0xff]  ;;  %v24_v8 = vld [vmem:[%s587_s1] sm:$0xff]  ;;  %v39_v18 = vld [vmem:[%s590_s2 + $0x38] sm:$0xff] }
   0x4   :  { %406 = vmatpush3.msra.mxu0 %v30_v2  ;;  %v23_v9 = vld [vmem:[%s588_s0] sm:$0x3]  ;;  %v38_v19 = vld [vmem:[%s590_s2 + $0x30] sm:$0xff]  ;;  %v37_v20 = vld [vmem:[%s590_s2 + $0x28] sm:$0xff] }
   0x5   :  { %407 = vmatprep.subr.mxu0 %v457_v0  ;;  %v40_v10 = vld [vmem:[%s589_s3] sm:$0xf]  ;;  %v35_v22 = vld [vmem:[%s590_s2 + $0x18] sm:$0xff]  ;;  %v34_v23 = vld [vmem:[%s590_s2 + $0x10] sm:$0xff] }
   0x6   :  { %408 = vmatpush3.msra.mxu0 %v29_v3  ;;  %423 = vmatpush3.msk.msra.mxu1 %vm126_vm2, %v40_v10  ;;  %v36_v21 = vld [vmem:[%s590_s2 + $0x20] sm:$0xff]  ;;  %v33_v24 = vld [vmem:[%s590_s2 + $0x8] sm:$0xff] }
   0x7   :  { %409 = vmatprep.subr.mxu0 %v457_v0  ;;  %427 = vmatprep.subr.mxu1 %v457_v0  ;;  %v32_v25 = vld [vmem:[%s590_s2] sm:$0xff] }
   0x8   :  { %410 = vmatpush3.msra.mxu0 %v28_v4  ;;  %v377_v34 = vld [vmem:[%s591_s4] ss:$0 sm:$0xff] }
   0x9   :  { %411 = vmatprep.subr.mxu0 %v457_v0  ;;  %v380_v37 = vld [vmem:[%s592_s5] ss:$0 sm:$0xff] }
   0xa   :  { %412 = vmatpush3.msra.mxu0 %v27_v5 }
   0xb   :  { %413 = vmatprep.subr.mxu0 %v457_v0 }
   0xc   :  { %414 = vmatpush3.msra.mxu0 %v26_v6 }
   0xd   :  { %415 = vmatprep.subr.mxu0 %v457_v0 }
   0xe   :  { %416 = vmatpush3.msra.mxu0 %v25_v7 }
   0xf   :  { %417 = vmatprep.subr.mxu0 %v457_v0 }
  0x10   :  { %418 = vmatpush3.msra.mxu0 %v24_v8 }
  0x11   :  { %420 = vmatmul.mubr.msk.f32.vlgmr.msra.gmra.mxu0 %vm43_vm1, %v23_v9  ;;  %446 = vmatprep.subr.mxu0 %v457_v0 }
  0x12   :  { %448 = vmatprep.mubr.msk.f32.mxu0 %vm458_vm0, %v457_v0  ;;  %447 = vmatpush3.msk.msra.mxu0 %vm126_vm2, %v40_v10 }
  0xd1   :  { %v113_v11 = vpop.f32.mrf.mxu0 }
  0xd2   :  { %v118_v12 = vmul.f32 0.70710677, %v113_v11  ;;  %v117_v15 = vmul.f32 0.5, %v113_v11 }
  0xd3   :  { %v421_v13 = vpop.f32.mrf.mxu0 }
  0xd4   :  { %453 = verf.f32 %v118_v12 }
  0xe1   :  { %v454_v14 = vpop.eup %453 }
  0xe2   :  { %v120_v16 = vadd.f32 1.0, %v454_v14 }
  0xe4   :  { %v121_v17 = vmul.f32 %v120_v16, %v117_v15 }
  0xe6   :  { %425 = vmatmul.mubr.msk.f32.vlgmr.msra.gmra.mxu1 %vm122_vm3, %v121_v17 }
  0xe7   :  { %428 = vmatpush3.msra.mxu1 %v39_v18  ;;  %443 = vmatprep.mubr.msk.f32.mxu1 %vm458_vm0, %v457_v0 }
  0xe8   :  { %429 = vmatprep.subr.mxu1 %v457_v0 }
  0xe9   :  { %430 = vmatpush3.msra.mxu1 %v38_v19 }
  0xea   :  { %431 = vmatprep.subr.mxu1 %v457_v0 }
  0xeb   :  { %432 = vmatpush3.msra.mxu1 %v37_v20 }
  0xec   :  { %433 = vmatprep.subr.mxu1 %v457_v0 }
  0xed   :  { %434 = vmatpush3.msra.mxu1 %v36_v21 }
  0xee   :  { %435 = vmatprep.subr.mxu1 %v457_v0 }
  0xef   :  { %436 = vmatpush3.msra.mxu1 %v35_v22 }
  0xf0   :  { %437 = vmatprep.subr.mxu1 %v457_v0 }
  0xf1   :  { %438 = vmatpush3.msra.mxu1 %v34_v23 }
  0xf2   :  { %439 = vmatprep.subr.mxu1 %v457_v0 }
  0xf3   :  { %440 = vmatpush3.msra.mxu1 %v33_v24 }
  0xf4   :  { %441 = vmatprep.subr.mxu1 %v457_v0 }
  0xf5   :  { %442 = vmatpush3.msra.mxu1 %v32_v25 }
 0x1a6   :  { %v196_v26 = vpop.f32.mrf.mxu1 }
 0x1a7   :  { %v200_v27 = vsub.f32 %v23_v9, %v196_v26 }
 0x1a8   :  { %v426_v28 = vpop.f32.mrf.mxu1 }
 0x1a9   :  { %v201_v29 = vmul.f32 %v200_v27, %v200_v27 }
 0x1ab   :  { %444 = vmatmul.mubr.msk.f32.vlgmr.msra.gmra.mxu1 %vm43_vm1, %v201_v29 }
 0x26b   :  { %v271_v30 = vpop.f32.mrf.mxu1 }
 0x26c   :  { %v276_v31 = vmul.f32 0.06666667, %v271_v30 }
 0x26d   :  { %v445_v32 = vpop.f32.mrf.mxu1 }
 0x26e   :  { %v277_v33 = vadd.f32 1e-08, %v276_v31 }
 0x270   :  { %455 = vrsqrt.f32 %v277_v33 }
 0x27d   :  { %v456_v35 = vpop.eup %455 }
 0x27e   :  { %v285_v36 = vmul.f32 %v456_v35, %v377_v34 }
 0x280   :  { %449 = vmatmul.mubr.msk.f32.vlgmr.msra.gmra.mxu0 %vm122_vm3, %v285_v36 }
 0x340   :  { %v355_v38 = vpop.f32.mrf.mxu0 }
 0x341   :  { %v359_v39 = vmul.f32 %v355_v38, %v200_v27 }
 0x342   :  { %v450_v40 = vpop.f32.mrf.mxu0 }
 0x343   :  { %v366_v41 = vadd.f32 %v380_v37, %v359_v39 }
 0x345   :  { %368 = vst.msk [vmem:[%s593_s6] sm:$0x3] %vm367_vm4, %v366_v41 }

</bundles_post_ra>
